<compile_context>
chip_gen: v7x
topology: tpu7x:2x2x1
jax: 0.10.0
libtpu: 0.0.40
codegen_flags: <defaults>
</compile_context>

<pallas_src>
import jax
import jax.numpy as jnp
from jax import lax
from jax.experimental import pallas as pl
from jax.experimental.pallas import tpu as pltpu


def _stable_softplus(z):
    # softplus(z) = max(z, 0) + log1p(exp(-|z|))   (numerically stable)
    return jnp.maximum(z, 0.0) + jnp.log1p(jnp.exp(-jnp.abs(z)))


def _classification_loss_kernel(pred_ref, gt_ref, out_ref):
    x = pred_ref[...].astype(jnp.float32)   # [B, N] logits (f32 compute on all gens)
    y = gt_ref[...].astype(jnp.float32)     # [B, N] labels in {0, 1}
    B, N = x.shape
    total = float(B * N)
    inv_total = 1.0 / total

    # ---- one softplus per element; softplus(x) = softplus(-x) + x ----
    sp_neg_x = _stable_softplus(-x)          # -log(sigmoid(x))

    # ---- 5 full-array reductions (everything else derived) ----
    s_pos  = jnp.sum(y * sp_neg_x, keepdims=True)   # (1,1) sum y*softplus(-x)
    s_sp   = jnp.sum(sp_neg_x, keepdims=True)       # (1,1) sum softplus(-x)
    sum_x  = jnp.sum(x, keepdims=True)               # (1,1) sum x
    sum_xy = jnp.sum(x * y, keepdims=True)           # (1,1) sum x*y
    sum_gt = jnp.sum(y, keepdims=True)                # (1,1) sum y

    # derived quantities (complement identities):
    #   softplus(x) = softplus(-x) + x  =>
    #   sum((1-y)*softplus(x)) = sum(softplus(-x)) + sum(x) - s_pos - sum(x*y)
    s_neg   = s_sp + sum_x - s_pos - sum_xy
    sum_ng  = total - sum_gt
    sum_xny = sum_x - sum_xy

    # ---- balanced pos_weight = num_neg / num_pos ----
    num_pos = jnp.maximum(sum_gt - 1.0, 0.0) + 1.0
    num_neg = jnp.maximum(sum_ng - 1.0, 0.0) + 1.0
    pos_weight = num_neg / num_pos

    loss = (pos_weight * s_pos + s_neg) * inv_total                      # (1,1)

    # ---- precision / recall / f1 on batch element 0 ----
    x0 = x[0:1, :]
    y0 = y[0:1, :]                                   # already an exact {0,1} mask
    pred_pos = (x0 > 0.0).astype(jnp.float32)
    tp         = jnp.sum(pred_pos * y0, keepdims=True)   # (1,1)
    n_pred_pos = jnp.sum(pred_pos, keepdims=True)         # tp + fp
    n_gt_pos   = jnp.sum(y0, keepdims=True)               # tp + fn

    # counts are exact integers in f32; tp == 0 whenever the denominator is 0,
    # so max(denom, 1) reproduces sklearn's zero_division -> 0 behavior.
    precision = tp / jnp.maximum(n_pred_pos, 1.0)
    recall    = tp / jnp.maximum(n_gt_pos, 1.0)
    pr_sum = precision + recall
    f1 = jnp.where(pr_sum > 0.0,
                   2.0 * precision * recall / jnp.where(pr_sum > 0.0, pr_sum, 1.0),
                   0.0)

    # ---- mean logits for inliers / outliers (whole batch) ----
    logit_true  = sum_xy  / jnp.maximum(1.0, sum_gt)
    logit_false = sum_xny / jnp.maximum(1.0, sum_ng)

    # ---- pack the six scalars into a lane-dense (1, 128) output row ----
    lane = lax.broadcasted_iota(jnp.int32, (1, 128), 1)
    acc = jnp.where(lane == 0, loss, 0.0)
    for i, v in enumerate([precision, recall, f1, logit_true, logit_false], start=1):
        acc = acc + jnp.where(lane == i, v, 0.0)
    out_ref[...] = acc


def classification_loss_pallas(pred, gt):
    """Balanced ClassificationLoss forward (eval stats) as one Pallas call.

    `pred` / `gt` are passed in their native dtypes; the kernel casts to f32
    on load (no extra wrapper-side XLA cast pass, narrower HBM->VMEM DMA when
    the caller supplies bf16/int8/bool inputs).
    """
    B, N = pred.shape
    out = pl.pallas_call(
        _classification_loss_kernel,
        out_shape=jax.ShapeDtypeStruct((1, 128), jnp.float32),
        grid_spec=pltpu.PrefetchScalarGridSpec(
            num_scalar_prefetch=0,
            grid=(1,),
            in_specs=[
                pl.BlockSpec((B, N), lambda i: (0, 0)),   # pred
                pl.BlockSpec((B, N), lambda i: (0, 0)),   # gt
            ],
            out_specs=pl.BlockSpec((1, 128), lambda i: (0, 0)),
        ),
        compiler_params=pltpu.CompilerParams(
            dimension_semantics=("arbitrary",)),
    )(pred, gt)
    return {
        "loss": out[0, 0],
        "precision": out[0, 1],
        "recall": out[0, 2],
        "f1": out[0, 3],
        "logit_true": out[0, 4],
        "logit_false": out[0, 5],
    }


def classification_loss_ref(pred, gt):
    """Pure-JAX reference mirroring the PyTorch forward (balanced, no weight)."""
    x = pred.astype(jnp.float32)
    y = gt.astype(jnp.float32)
    total = x.size

    num_pos = jnp.maximum(jnp.sum(y) - 1.0, 0.0) + 1.0
    num_neg = jnp.maximum(jnp.sum(1.0 - y) - 1.0, 0.0) + 1.0
    pos_weight = num_neg / num_pos

    per_elem = pos_weight * y * _stable_softplus(-x) + (1.0 - y) * _stable_softplus(x)
    loss = jnp.sum(per_elem) / total

    pred_pos = (x[0] > 0.0).astype(jnp.float32)
    gt_pos = (y[0] > 0.5).astype(jnp.float32)
    tp = jnp.sum(pred_pos * gt_pos)
    fp = jnp.sum(pred_pos * (1.0 - gt_pos))
    fn = jnp.sum((1.0 - pred_pos) * gt_pos)
    precision = jnp.where(tp + fp > 0.0, tp / jnp.maximum(tp + fp, 1.0), 0.0)
    recall = jnp.where(tp + fn > 0.0, tp / jnp.maximum(tp + fn, 1.0), 0.0)
    pr_sum = precision + recall
    f1 = jnp.where(pr_sum > 0.0,
                   2.0 * precision * recall / jnp.where(pr_sum > 0.0, pr_sum, 1.0),
                   0.0)

    logit_true = jnp.sum(x * y) / jnp.maximum(1.0, jnp.sum(y))
    logit_false = jnp.sum(x * (1.0 - y)) / jnp.maximum(1.0, jnp.sum(1.0 - y))
    return {
        "loss": loss,
        "precision": precision,
        "recall": recall,
        "f1": f1,
        "logit_true": logit_true,
        "logit_false": logit_false,
    }


if __name__ == "__main__":
    # Small shapes consistent with the module: pred/gt are [bs, num_corr].
    B, N = 2, 256

    key = jax.random.PRNGKey(0)
    k1, k2 = jax.random.split(key)
    pred = 2.0 * jax.random.normal(k1, (B, N), dtype=jnp.float32)      # logits
    gt = jax.random.bernoulli(k2, 0.3, (B, N)).astype(jnp.float32)     # 0/1 labels

    out = classification_loss_pallas(pred, gt)
    out = jax.block_until_ready(out)

    ref = classification_loss_ref(pred, gt)
    for k in ["loss", "precision", "recall", "f1", "logit_true", "logit_false"]:
        assert jnp.allclose(out[k], ref[k], atol=1e-4, rtol=1e-4), (
            f"mismatch in {k}: {out[k]} vs {ref[k]}")

    print("KERNEL_OK")
</pallas_src>

<mosaic_0001>
module attributes {stable_mosaic.version = 11 : i64} {
  func.func @_classification_loss_kernel(%arg0: i32, %arg1: memref<2x256xf32, #tpu.memory_space<vmem>>, %arg2: memref<2x256xf32, #tpu.memory_space<vmem>>, %arg3: memref<1x128xf32, #tpu.memory_space<vmem>>) attributes {dimension_semantics = [#tpu.dimension_semantics<arbitrary>], iteration_bounds = array<i64: 1>, scalar_prefetch = 0 : i64, scratch_operands = 0 : i64, tpu.core_type = #tpu.core_type<tc>, window_params = [{pipeline_mode = #tpu.pipeline_mode<synchronous>, transform_indices = @transform_0, window_bounds = array<i64: 2, 256>}, {pipeline_mode = #tpu.pipeline_mode<synchronous>, transform_indices = @transform_1, window_bounds = array<i64: 2, 256>}, {pipeline_mode = #tpu.pipeline_mode<synchronous>, transform_indices = @transform_2, window_bounds = array<i64: 1, 128>}]} {
    %c0 = arith.constant 0 : index
    %c0_0 = arith.constant 0 : index
    %0 = vector.load %arg1[%c0, %c0_0] : memref<2x256xf32, #tpu.memory_space<vmem>>, vector<2x256xf32>
    %c0_1 = arith.constant 0 : index
    %c0_2 = arith.constant 0 : index
    %1 = vector.load %arg2[%c0_1, %c0_2] : memref<2x256xf32, #tpu.memory_space<vmem>>, vector<2x256xf32>
    %cst = arith.constant 0.000000e+00 : f32
    %2 = vector.broadcast %cst : f32 to vector<2x256xf32>
    %3 = arith.subf %2, %0 : vector<2x256xf32>
    %cst_3 = arith.constant 0.000000e+00 : f32
    %4 = vector.broadcast %cst_3 : f32 to vector<2x256xf32>
    %5 = arith.maximumf %3, %4 : vector<2x256xf32>
    %6 = math.absf %3 : vector<2x256xf32>
    %cst_4 = arith.constant 0.000000e+00 : f32
    %7 = vector.broadcast %cst_4 : f32 to vector<2x256xf32>
    %8 = arith.subf %7, %6 : vector<2x256xf32>
    %9 = math.exp %8 : vector<2x256xf32>
    %10 = math.log1p %9 : vector<2x256xf32>
    %11 = arith.addf %5, %10 : vector<2x256xf32>
    %12 = arith.mulf %1, %11 : vector<2x256xf32>
    %13 = vector.shape_cast %12 : vector<2x256xf32> to vector<1x2x256xf32>
    %cst_5 = arith.constant dense<0.000000e+00> : vector<1xf32>
    %14 = vector.multi_reduction <add>, %13, %cst_5 [1, 2] : vector<1x2x256xf32> to vector<1xf32>
    %15 = vector.shape_cast %14 : vector<1xf32> to vector<1x1x1xf32>
    %16 = vector.extract %15[0, 0, 0] : f32 from vector<1x1x1xf32>
    %17 = vector.broadcast %16 : f32 to vector<1x1xf32>
    %18 = vector.shape_cast %11 : vector<2x256xf32> to vector<1x2x256xf32>
    %cst_6 = arith.constant dense<0.000000e+00> : vector<1xf32>
    %19 = vector.multi_reduction <add>, %18, %cst_6 [1, 2] : vector<1x2x256xf32> to vector<1xf32>
    %20 = vector.shape_cast %19 : vector<1xf32> to vector<1x1x1xf32>
    %21 = vector.extract %20[0, 0, 0] : f32 from vector<1x1x1xf32>
    %22 = vector.broadcast %21 : f32 to vector<1x1xf32>
    %23 = vector.shape_cast %0 : vector<2x256xf32> to vector<1x2x256xf32>
    %cst_7 = arith.constant dense<0.000000e+00> : vector<1xf32>
    %24 = vector.multi_reduction <add>, %23, %cst_7 [1, 2] : vector<1x2x256xf32> to vector<1xf32>
    %25 = vector.shape_cast %24 : vector<1xf32> to vector<1x1x1xf32>
    %26 = vector.extract %25[0, 0, 0] : f32 from vector<1x1x1xf32>
    %27 = vector.broadcast %26 : f32 to vector<1x1xf32>
    %28 = arith.mulf %0, %1 : vector<2x256xf32>
    %29 = vector.shape_cast %28 : vector<2x256xf32> to vector<1x2x256xf32>
    %cst_8 = arith.constant dense<0.000000e+00> : vector<1xf32>
    %30 = vector.multi_reduction <add>, %29, %cst_8 [1, 2] : vector<1x2x256xf32> to vector<1xf32>
    %31 = vector.shape_cast %30 : vector<1xf32> to vector<1x1x1xf32>
    %32 = vector.extract %31[0, 0, 0] : f32 from vector<1x1x1xf32>
    %33 = vector.broadcast %32 : f32 to vector<1x1xf32>
    %34 = vector.shape_cast %1 : vector<2x256xf32> to vector<1x2x256xf32>
    %cst_9 = arith.constant dense<0.000000e+00> : vector<1xf32>
    %35 = vector.multi_reduction <add>, %34, %cst_9 [1, 2] : vector<1x2x256xf32> to vector<1xf32>
    %36 = vector.shape_cast %35 : vector<1xf32> to vector<1x1x1xf32>
    %37 = vector.extract %36[0, 0, 0] : f32 from vector<1x1x1xf32>
    %38 = vector.broadcast %37 : f32 to vector<1x1xf32>
    %39 = arith.addf %22, %27 : vector<1x1xf32>
    %40 = arith.subf %39, %17 : vector<1x1xf32>
    %41 = arith.subf %40, %33 : vector<1x1xf32>
    %cst_10 = arith.constant 5.120000e+02 : f32
    %42 = vector.broadcast %cst_10 : f32 to vector<1x1xf32>
    %43 = arith.subf %42, %38 : vector<1x1xf32>
    %44 = arith.subf %27, %33 : vector<1x1xf32>
    %cst_11 = arith.constant 1.000000e+00 : f32
    %45 = vector.broadcast %cst_11 : f32 to vector<1x1xf32>
    %46 = arith.subf %38, %45 : vector<1x1xf32>
    %cst_12 = arith.constant 0.000000e+00 : f32
    %47 = vector.broadcast %cst_12 : f32 to vector<1x1xf32>
    %48 = arith.maximumf %46, %47 : vector<1x1xf32>
    %cst_13 = arith.constant 1.000000e+00 : f32
    %49 = vector.broadcast %cst_13 : f32 to vector<1x1xf32>
    %50 = arith.addf %48, %49 : vector<1x1xf32>
    %cst_14 = arith.constant 1.000000e+00 : f32
    %51 = vector.broadcast %cst_14 : f32 to vector<1x1xf32>
    %52 = arith.subf %43, %51 : vector<1x1xf32>
    %cst_15 = arith.constant 0.000000e+00 : f32
    %53 = vector.broadcast %cst_15 : f32 to vector<1x1xf32>
    %54 = arith.maximumf %52, %53 : vector<1x1xf32>
    %cst_16 = arith.constant 1.000000e+00 : f32
    %55 = vector.broadcast %cst_16 : f32 to vector<1x1xf32>
    %56 = arith.addf %54, %55 : vector<1x1xf32>
    %57 = arith.divf %56, %50 : vector<1x1xf32>
    %58 = arith.mulf %57, %17 : vector<1x1xf32>
    %59 = arith.addf %58, %41 : vector<1x1xf32>
    %cst_17 = arith.constant 0.001953125 : f32
    %60 = vector.broadcast %cst_17 : f32 to vector<1x1xf32>
    %61 = arith.mulf %59, %60 : vector<1x1xf32>
    %62 = vector.extract_strided_slice %0 {offsets = [0, 0], sizes = [1, 256], strides = [1, 1]} : vector<2x256xf32> to vector<1x256xf32>
    %63 = vector.extract_strided_slice %1 {offsets = [0, 0], sizes = [1, 256], strides = [1, 1]} : vector<2x256xf32> to vector<1x256xf32>
    %cst_18 = arith.constant 0.000000e+00 : f32
    %64 = vector.broadcast %cst_18 : f32 to vector<1x256xf32>
    %65 = arith.cmpf ogt, %62, %64 : vector<1x256xf32>
    %66 = arith.extui %65 : vector<1x256xi1> to vector<1x256xi32>
    %67 = arith.sitofp %66 : vector<1x256xi32> to vector<1x256xf32>
    %68 = arith.mulf %67, %63 : vector<1x256xf32>
    %69 = vector.shape_cast %68 : vector<1x256xf32> to vector<1x1x256xf32>
    %cst_19 = arith.constant dense<0.000000e+00> : vector<1xf32>
    %70 = vector.multi_reduction <add>, %69, %cst_19 [1, 2] : vector<1x1x256xf32> to vector<1xf32>
    %71 = vector.shape_cast %70 : vector<1xf32> to vector<1x1x1xf32>
    %72 = vector.extract %71[0, 0, 0] : f32 from vector<1x1x1xf32>
    %73 = vector.broadcast %72 : f32 to vector<1x1xf32>
    %74 = vector.shape_cast %67 : vector<1x256xf32> to vector<1x1x256xf32>
    %cst_20 = arith.constant dense<0.000000e+00> : vector<1xf32>
    %75 = vector.multi_reduction <add>, %74, %cst_20 [1, 2] : vector<1x1x256xf32> to vector<1xf32>
    %76 = vector.shape_cast %75 : vector<1xf32> to vector<1x1x1xf32>
    %77 = vector.extract %76[0, 0, 0] : f32 from vector<1x1x1xf32>
    %78 = vector.broadcast %77 : f32 to vector<1x1xf32>
    %79 = vector.shape_cast %63 : vector<1x256xf32> to vector<1x1x256xf32>
    %cst_21 = arith.constant dense<0.000000e+00> : vector<1xf32>
    %80 = vector.multi_reduction <add>, %79, %cst_21 [1, 2] : vector<1x1x256xf32> to vector<1xf32>
    %81 = vector.shape_cast %80 : vector<1xf32> to vector<1x1x1xf32>
    %82 = vector.extract %81[0, 0, 0] : f32 from vector<1x1x1xf32>
    %83 = vector.broadcast %82 : f32 to vector<1x1xf32>
    %cst_22 = arith.constant 1.000000e+00 : f32
    %84 = vector.broadcast %cst_22 : f32 to vector<1x1xf32>
    %85 = arith.maximumf %78, %84 : vector<1x1xf32>
    %86 = arith.divf %73, %85 : vector<1x1xf32>
    %cst_23 = arith.constant 1.000000e+00 : f32
    %87 = vector.broadcast %cst_23 : f32 to vector<1x1xf32>
    %88 = arith.maximumf %83, %87 : vector<1x1xf32>
    %89 = arith.divf %73, %88 : vector<1x1xf32>
    %90 = arith.addf %86, %89 : vector<1x1xf32>
    %cst_24 = arith.constant 0.000000e+00 : f32
    %91 = vector.broadcast %cst_24 : f32 to vector<1x1xf32>
    %92 = arith.cmpf ogt, %90, %91 : vector<1x1xf32>
    %cst_25 = arith.constant 2.000000e+00 : f32
    %93 = vector.broadcast %cst_25 : f32 to vector<1x1xf32>
    %94 = arith.mulf %93, %86 : vector<1x1xf32>
    %95 = arith.mulf %94, %89 : vector<1x1xf32>
    %cst_26 = arith.constant 0.000000e+00 : f32
    %96 = vector.broadcast %cst_26 : f32 to vector<1x1xf32>
    %97 = arith.cmpf ogt, %90, %96 : vector<1x1xf32>
    %cst_27 = arith.constant 1.000000e+00 : f32
    %98 = vector.broadcast %cst_27 : f32 to vector<1x1xf32>
    %99 = arith.select %97, %90, %98 : vector<1x1xi1>, vector<1x1xf32>
    %100 = arith.divf %95, %99 : vector<1x1xf32>
    %cst_28 = arith.constant 0.000000e+00 : f32
    %101 = vector.broadcast %cst_28 : f32 to vector<1x1xf32>
    %102 = arith.select %92, %100, %101 : vector<1x1xi1>, vector<1x1xf32>
    %cst_29 = arith.constant 1.000000e+00 : f32
    %103 = vector.broadcast %cst_29 : f32 to vector<1x1xf32>
    %104 = arith.maximumf %103, %38 : vector<1x1xf32>
    %105 = arith.divf %33, %104 : vector<1x1xf32>
    %cst_30 = arith.constant 1.000000e+00 : f32
    %106 = vector.broadcast %cst_30 : f32 to vector<1x1xf32>
    %107 = arith.maximumf %106, %43 : vector<1x1xf32>
    %108 = arith.divf %44, %107 : vector<1x1xf32>
    %109 = tpu.iota {dimensions = array<i32: 1>} : vector<1x128xi32>
    %c0_i32 = arith.constant 0 : i32
    %110 = vector.broadcast %c0_i32 : i32 to vector<1x128xi32>
    %111 = arith.cmpi eq, %109, %110 : vector<1x128xi32>
    %cst_31 = arith.constant 0.000000e+00 : f32
    %112 = vector.shape_cast %61 : vector<1x1xf32> to vector<1x1xf32>
    %113 = vector.broadcast %112 : vector<1x1xf32> to vector<1x128xf32>
    %114 = vector.broadcast %cst_31 : f32 to vector<1x128xf32>
    %115 = arith.select %111, %113, %114 : vector<1x128xi1>, vector<1x128xf32>
    %c1_i32 = arith.constant 1 : i32
    %116 = vector.broadcast %c1_i32 : i32 to vector<1x128xi32>
    %117 = arith.cmpi eq, %109, %116 : vector<1x128xi32>
    %cst_32 = arith.constant 0.000000e+00 : f32
    %118 = vector.shape_cast %86 : vector<1x1xf32> to vector<1x1xf32>
    %119 = vector.broadcast %118 : vector<1x1xf32> to vector<1x128xf32>
    %120 = vector.broadcast %cst_32 : f32 to vector<1x128xf32>
    %121 = arith.select %117, %119, %120 : vector<1x128xi1>, vector<1x128xf32>
    %122 = arith.addf %115, %121 : vector<1x128xf32>
    %c2_i32 = arith.constant 2 : i32
    %123 = vector.broadcast %c2_i32 : i32 to vector<1x128xi32>
    %124 = arith.cmpi eq, %109, %123 : vector<1x128xi32>
    %cst_33 = arith.constant 0.000000e+00 : f32
    %125 = vector.shape_cast %89 : vector<1x1xf32> to vector<1x1xf32>
    %126 = vector.broadcast %125 : vector<1x1xf32> to vector<1x128xf32>
    %127 = vector.broadcast %cst_33 : f32 to vector<1x128xf32>
    %128 = arith.select %124, %126, %127 : vector<1x128xi1>, vector<1x128xf32>
    %129 = arith.addf %122, %128 : vector<1x128xf32>
    %c3_i32 = arith.constant 3 : i32
    %130 = vector.broadcast %c3_i32 : i32 to vector<1x128xi32>
    %131 = arith.cmpi eq, %109, %130 : vector<1x128xi32>
    %cst_34 = arith.constant 0.000000e+00 : f32
    %132 = vector.shape_cast %102 : vector<1x1xf32> to vector<1x1xf32>
    %133 = vector.broadcast %132 : vector<1x1xf32> to vector<1x128xf32>
    %134 = vector.broadcast %cst_34 : f32 to vector<1x128xf32>
    %135 = arith.select %131, %133, %134 : vector<1x128xi1>, vector<1x128xf32>
    %136 = arith.addf %129, %135 : vector<1x128xf32>
    %c4_i32 = arith.constant 4 : i32
    %137 = vector.broadcast %c4_i32 : i32 to vector<1x128xi32>
    %138 = arith.cmpi eq, %109, %137 : vector<1x128xi32>
    %cst_35 = arith.constant 0.000000e+00 : f32
    %139 = vector.shape_cast %105 : vector<1x1xf32> to vector<1x1xf32>
    %140 = vector.broadcast %139 : vector<1x1xf32> to vector<1x128xf32>
    %141 = vector.broadcast %cst_35 : f32 to vector<1x128xf32>
    %142 = arith.select %138, %140, %141 : vector<1x128xi1>, vector<1x128xf32>
    %143 = arith.addf %136, %142 : vector<1x128xf32>
    %c5_i32 = arith.constant 5 : i32
    %144 = vector.broadcast %c5_i32 : i32 to vector<1x128xi32>
    %145 = arith.cmpi eq, %109, %144 : vector<1x128xi32>
    %cst_36 = arith.constant 0.000000e+00 : f32
    %146 = vector.shape_cast %108 : vector<1x1xf32> to vector<1x1xf32>
    %147 = vector.broadcast %146 : vector<1x1xf32> to vector<1x128xf32>
    %148 = vector.broadcast %cst_36 : f32 to vector<1x128xf32>
    %149 = arith.select %145, %147, %148 : vector<1x128xi1>, vector<1x128xf32>
    %150 = arith.addf %143, %149 : vector<1x128xf32>
    %c0_37 = arith.constant 0 : index
    %c0_38 = arith.constant 0 : index
    %151 = vector.load %arg3[%c0_37, %c0_38] : memref<1x128xf32, #tpu.memory_space<vmem>>, vector<1x128xf32>
    tpu.vector_store %arg3[%c0_37, %c0_38], %150 {strides = array<i32>} : memref<1x128xf32, #tpu.memory_space<vmem>>, vector<1x128xf32>,
    return
  }
  func.func @transform_0(%arg0: i32) -> (i32, i32) {
    %c0_i32 = arith.constant 0 : i32
    %c0_i32_0 = arith.constant 0 : i32
    %c0_i32_1 = arith.constant 0 : i32
    return %c0_i32, %c0_i32_0 : i32, i32
  }
  func.func @transform_1(%arg0: i32) -> (i32, i32) {
    %c0_i32 = arith.constant 0 : i32
    %c0_i32_0 = arith.constant 0 : i32
    %c0_i32_1 = arith.constant 0 : i32
    return %c0_i32, %c0_i32_0 : i32, i32
  }
  func.func @transform_2(%arg0: i32) -> (i32, i32) {
    %c0_i32 = arith.constant 0 : i32
    %c0_i32_0 = arith.constant 0 : i32
    %c0_i32_1 = arith.constant 0 : i32
    return %c0_i32, %c0_i32_0 : i32, i32
  }
}

</mosaic_0001>

<bundles_post_ra>
// kernel: tpu_custom_call.1
= control target key start
LH: loop header
LB: loop body
LE: loop exit
PB: predicated region body
PF: predicated region fallthrough
CT: control target
= control target key end

     0   :  { %7 = vsyncpa [#allocation3], 0  ;;  %s544_s0 = inlined_call_operand.hbm [shape: f32[2,256], index: 0, kind: input, shape index: {}]   ;;  %s545_s1 = inlined_call_operand.hbm [shape: f32[2,256], index: 1, kind: input, shape index: {}]   ;;  %s546_s2 = inlined_call_operand.hbm [shape: f32[1,128], index: 2, kind: output, shape index: {}]  }
   0x1   :  { %8 = vsyncpa [#allocation6], 0 }
   0x2   :  { %9 = vsyncpa [#allocation4], 0  ;;  %s437_s9 = smov [#allocation2]   ;;  %s438_s11 = smov [#allocation5]  }
   0x3   :  { %s16_s10 = sshll.u32 %s437_s9, 4  ;;  %s26_s12 = sshll.u32 %s438_s11, 4  ;;  %s17_s10 = int_to_ptr.vmem [resolvable:$true] %s16_s10  ;;  %s27_s12 = int_to_ptr.vmem [resolvable:$true] %s26_s12 }
   0x4   :  { %s365_s15 = scalar_lea.hbm %s544_s0, 64 }
   0x5   :  { %p366_p0 = scmp.ne.s32.totalorder %s544_s0, %s365_s15  ;;  %p369_p1 = scmp.lt.u32.totalorder %s365_s15, %s544_s0 }
   0x7   :  { %p371_p2 = pnand %p369_p1, %p366_p0 }
   0x9   :  { %374 = shalt.err (!%p371_p2)
}
   0xa   :  { %s375_s20 = scalar_lea.vmem %s17_s10, 64  ;;  %p380_p4 = scmp.lt.s32.totalorder %s17_s10, %s17_s10 }
   0xb   :  { %p376_p3 = scmp.ne.s32.totalorder %s17_s10, %s375_s20  ;;  %p381_p5 = scmp.lt.s32.totalorder %s375_s20, %s375_s20 }
   0xd   :  { %p382_p6 = por %p381_p5, %p380_p4 }
   0xf   :  { %p383_p7 = pnand %p382_p6, %p376_p3 }
  0x11   :  { %386 = shalt.err (!%p383_p7)
}
  0x12   :  { %19 = dma.hbm_to_vmem [thread:$0]  %s544_s0, 64, %s17_s10, [#allocation3]  }
  0x13   :  { %s387_s25 = scalar_lea.hbm %s545_s1, 64 }
  0x14   :  { %p388_p8 = scmp.ne.s32.totalorder %s545_s1, %s387_s25  ;;  %p391_p9 = scmp.lt.u32.totalorder %s387_s25, %s545_s1 }
  0x16   :  { %p393_p10 = pnand %p391_p9, %p388_p8 }
  0x18   :  { %396 = shalt.err (!%p393_p10)
}
  0x19   :  { %s397_s30 = scalar_lea.vmem %s27_s12, 64  ;;  %p402_p12 = scmp.lt.s32.totalorder %s27_s12, %s27_s12 }
  0x1a   :  { %p398_p11 = scmp.ne.s32.totalorder %s27_s12, %s397_s30  ;;  %p403_p13 = scmp.lt.s32.totalorder %s397_s30, %s397_s30 }
  0x1c   :  { %p404_p0 = por %p403_p13, %p402_p12 }
  0x1e   :  { %p405_p1 = pnand %p404_p0, %p398_p11 }
  0x20   :  { %408 = shalt.err (!%p405_p1)
}
  0x21   :  { %29 = dma.hbm_to_vmem [thread:$0]  %s545_s1, 64, %s27_s12, [#allocation6]  }
  0x22   :  { %431 = dma.done.wait [#allocation3], 64  }
  0x23   :  { %432 = vsyncadd [#allocation3], 4294967232 }
  0x24   :  { %433 = dma.done.wait [#allocation6], 64  }
  0x25   :  { %434 = vsyncadd [#allocation6], 4294967232  ;;  %v59_v0 = vlaneseq  ;;  %v439_v1 = vmov 1983009808   ;;  %v37_v6 = vld [vmem:[#allocation5] sm:$0xf] }
  0x26   :  { %v57_v2 = vunpack.c.l.s4 %v439_v1  ;;  %vm66_vm0 = vcmask 1041408   ;;  %v36_v7 = vld [vmem:[#allocation2] sm:$0xf]  ;;  %v440_v11 = vmov 0.0   ;;  %vm208_vm2 = vcmask 1040384   ;;  %s441_s11 = smov [#allocation7]  }
  0x27   :  { %v60_v3 = vshrl.u32 %v59_v0, 7  ;;  %v128_v10 = vmul.f32 %v37_v6, %v36_v7  ;;  %vm193_vm1 = vcmp.gt.f32.partialorder %v36_v7, 0.0  ;;  %v38_v15 = vsub.f32 0.0, %v36_v7  ;;  %s315_s12 = sshll.u32 %s441_s11, 4  ;;  %s316_s12 = int_to_ptr.vmem [resolvable:$true] %s315_s12 }
  0x28   :  { %v58_v4 = vunpack.c.0.s8 %v57_v2  ;;  %v486_v12 = vsel %vm193_vm1, 1.0, %v440_v11  ;;  %s409_s13 = scalar_lea.vmem %s316_s12, 16  ;;  %s413_s14 = scalar_lea.vmem %s316_s12, 32 }
  0x29   :  { %v488_v13 = vsub.s32 0, %v60_v3  ;;  %v490_v14 = vsub.s32 2, %v60_v3  ;;  %v196_v21 = vmul.f32 %v486_v12, %v37_v6  ;;  %v40_v22 = vand.u32 2147483647, %v38_v15  ;;  %p410_p2 = scmp.ne.s32.totalorder %s316_s12, %s409_s13  ;;  %p414_p3 = scmp.lt.s32.totalorder %s316_s12, %s316_s12 }
  0x2a   :  { %v482_v5 = vsub.s32 %v58_v4, %v60_v3  ;;  %v39_v50 = vmax.f32 %v38_v15, 0.0  ;;  %p415_p4 = scmp.lt.s32.totalorder %s413_s14, %s409_s13 }
  0x2b   :  { %v201_v29 = vrot.slane %v196_v21, %v488_v13  ;;  %v205_v30 = vrot.slane %v196_v21, %v490_v14  ;;  %v41_v31 = vsub.f32 0.0, %v40_v22  ;;  %v249_v33 = vrot.slane %v37_v6, %v488_v13 }
  0x2c   :  { %v160_v8 = vrot.slane %v37_v6, %v482_v5  ;;  %v111_v9 = vrot.slane %v36_v7, %v482_v5  ;;  %v136_v20 = vrot.slane %v128_v10, %v482_v5  ;;  %v253_v34 = vrot.slane %v37_v6, %v490_v14  ;;  %p416_p5 = por %p415_p4, %p414_p3 }
  0x2d   :  { %v209_v36 = vsel %vm208_vm2, %v201_v29, 0.0  ;;  %v210_v37 = vsel %vm208_vm2, %v205_v30, 0.0  ;;  %v42_v38 = vmul.f32 1.442695, %v41_v31  ;;  %v256_v40 = vsel %vm208_vm2, %v249_v33, 0.0 }
  0x2e   :  { %v161_v16 = vcombine.high %v160_v8, %v160_v8  ;;  %v164_v17 = vsel %vm66_vm0, %v160_v8, 0.0  ;;  %v112_v18 = vcombine.high %v111_v9, %v111_v9  ;;  %v115_v19 = vsel %vm66_vm0, %v111_v9, 0.0  ;;  %p417_p6 = pnand %p416_p5, %p410_p2 }
  0x2f   :  { %v137_v27 = vcombine.high %v136_v20, %v136_v20  ;;  %v140_v28 = vsel %vm66_vm0, %v136_v20, 0.0  ;;  %349 = vpow2.f32 %v42_v38  ;;  %v211_v39 = vadd.f32 %v210_v37, %v209_v36 }
  0x30   :  { %v165_v23 = vsel %vm66_vm0, %v161_v16, 0.0  ;;  %v116_v24 = vsel %vm66_vm0, %v112_v18, 0.0  ;;  %v257_v41 = vsel %vm208_vm2, %v253_v34, 0.0  ;;  %v226_v59 = vrot.slane %v486_v12, %v488_v13 }
  0x31   :  { %v166_v25 = vadd.f32 %v165_v23, %v164_v17  ;;  %v117_v26 = vadd.f32 %v116_v24, %v115_v19  ;;  %v141_v32 = vsel %vm66_vm0, %v137_v27, 0.0  ;;  %v258_v42 = vadd.f32 %v257_v41, %v256_v40 }
  0x32   :  { %v142_v35 = vadd.f32 %v141_v32, %v140_v28  ;;  %v230_v63 = vrot.slane %v486_v12, %v490_v14  ;;  %v233_v4 = vsel %vm208_vm2, %v226_v59, 0.0 }
  0x33   :  { %167 = vadd.xlane.f32.xlu0 %v166_v25  ;;  %118 = vadd.xlane.f32.xlu1 %v117_v26 }
  0x37   :  { %143 = vadd.xlane.f32.xlu1 %v142_v35 }
  0x39   :  { %v350_v43 = vpop.eup %349 }
  0x3a   :  { %v44_v44 = vadd.f32 1.0, %v350_v43  ;;  %v47_v45 = vmul.f32 -0.5, %v350_v43  ;;  %v50_v47 = vand.u32 2147483647, %v350_v43 }
  0x3b   :  { %212 = vadd.xlane.f32.xlu1 %v211_v39 }
  0x3c   :  { %351 = vlog2.f32 %v44_v44  ;;  %v48_v46 = vadd.f32 1.0, %v47_v45  ;;  %vm51_vm3 = vcmp.lt.f32.partialorder %v50_v47, 0.0004427343 }
  0x3e   :  { %v49_v48 = vmul.f32 %v350_v43, %v48_v46 }
  0x3f   :  { %259 = vadd.xlane.f32.xlu1 %v258_v42 }
  0x46   :  { %v352_v49 = vpop.eup %351 }
  0x47   :  { %v46_v51 = vmul.f32 0.6931472, %v352_v49 }
  0x49   :  { %v52_v52 = vsel %vm51_vm3, %v49_v48, %v46_v51 }
  0x4a   :  { %v53_v53 = vadd.f32 %v52_v52, %v39_v50 }
  0x4c   :  { %v87_v54 = vrot.slane %v53_v53, %v482_v5  ;;  %v54_v55 = vmul.f32 %v53_v53, %v37_v6 }
  0x4e   :  { %v88_v56 = vcombine.high %v87_v54, %v87_v54  ;;  %v91_v57 = vsel %vm66_vm0, %v87_v54, 0.0  ;;  %v62_v58 = vrot.slane %v54_v55, %v482_v5  ;;  %v234_v5 = vsel %vm208_vm2, %v230_v63, 0.0 }
  0x4f   :  { %v235_v6 = vadd.f32 %v234_v5, %v233_v4 }
  0x50   :  { %v92_v60 = vsel %vm66_vm0, %v88_v56, 0.0  ;;  %v63_v61 = vcombine.high %v62_v58, %v62_v58  ;;  %v67_v62 = vsel %vm66_vm0, %v62_v58, 0.0 }
  0x51   :  { %v93_v1 = vadd.f32 %v92_v60, %v91_v57 }
  0x52   :  { %v68_v2 = vsel %vm66_vm0, %v63_v61, 0.0 }
  0x53   :  { %94 = vadd.xlane.f32.xlu0 %v93_v1  ;;  %v69_v3 = vadd.f32 %v68_v2, %v67_v62 }
  0x57   :  { %70 = vadd.xlane.f32.xlu0 %v69_v3 }
  0x5b   :  { %236 = vadd.xlane.f32.xlu0 %v235_v6 }
  0xc0   :  { %v119_v7 = vpop.xlane.xlu1 %118  ;;  %v168_v10 = vpop.xlane.xlu0 %167 }
  0xc1   :  { %v120_v11 = vrot.slane %v119_v7, 4  ;;  %v169_v15 = vrot.slane %v168_v10, 4 }
  0xc3   :  { %v121_v17 = vadd.f32 %v120_v11, %v119_v7  ;;  %v170_v21 = vadd.f32 %v169_v15, %v168_v10 }
  0xc4   :  { %v144_v8 = vpop.xlane.xlu1 %143 }
  0xc5   :  { %v145_v13 = vrot.slane %v144_v8, 4  ;;  %v122_v25 = vrot.slane %v121_v17, 2  ;;  %v171_v30 = vrot.slane %v170_v21, 2 }
  0xc7   :  { %v146_v19 = vadd.f32 %v145_v13, %v144_v8  ;;  %v123_v37 = vadd.f32 %v122_v25, %v121_v17  ;;  %v172_v42 = vadd.f32 %v171_v30, %v170_v21 }
  0xc8   :  { %v213_v9 = vpop.xlane.xlu1 %212 }
  0xc9   :  { %v214_v14 = vrot.slane %v213_v9, 4  ;;  %v147_v28 = vrot.slane %v146_v19, 2  ;;  %v124_v47 = vrot.slane %v123_v37, 1  ;;  %v173_v52 = vrot.slane %v172_v42, 1 }
  0xcb   :  { %v215_v23 = vadd.f32 %v214_v14, %v213_v9  ;;  %v148_v39 = vadd.f32 %v147_v28, %v146_v19  ;;  %v125_v55 = vadd.f32 %v124_v47, %v123_v37  ;;  %v174_v59 = vadd.f32 %v173_v52, %v172_v42 }
  0xcc   :  { %v260_v12 = vpop.xlane.xlu1 %259 }
  0xcd   :  { %v261_v20 = vrot.slane %v260_v12, 4  ;;  %v216_v32 = vrot.slane %v215_v23, 2  ;;  %v149_v49 = vrot.slane %v148_v39, 1 }
  0xcf   :  { %v262_v29 = vadd.f32 %v261_v20, %v260_v12  ;;  %v217_v44 = vadd.f32 %v216_v32, %v215_v23  ;;  %v150_v57 = vadd.f32 %v149_v49, %v148_v39  ;;  %v290_v32 = vand.u32 127, %v59_v0 }
  0xd1   :  { %v263_v38 = vrot.slane %v262_v29, 2  ;;  %v218_v54 = vrot.slane %v217_v44, 1  ;;  %vm291_vm5 = vcmp.eq.s32.totalorder %v290_v32, 0  ;;  %vm293_vm6 = vcmp.eq.s32.totalorder %v290_v32, 1 }
  0xd2   :  { %vm296_vm7 = vcmp.eq.s32.totalorder %v290_v32, 2  ;;  %vm299_vm8 = vcmp.eq.s32.totalorder %v290_v32, 3  ;;  %vm302_vm9 = vcmp.eq.s32.totalorder %v290_v32, 4  ;;  %vm305_vm10 = vcmp.eq.s32.totalorder %v290_v32, 5 }
  0xd3   :  { %v264_v48 = vadd.f32 %v263_v38, %v262_v29  ;;  %v219_v61 = vadd.f32 %v218_v54, %v217_v44 }
  0xd5   :  { %v265_v58 = vrot.slane %v264_v48, 1 }
  0xd7   :  { %v266_v62 = vadd.f32 %v265_v58, %v264_v48 }
  0xe0   :  { %v95_v16 = vpop.xlane.xlu0 %94 }
  0xe1   :  { %v96_v18 = vrot.slane %v95_v16, 4 }
  0xe3   :  { %v97_v22 = vadd.f32 %v96_v18, %v95_v16 }
  0xe4   :  { %v71_v24 = vpop.xlane.xlu0 %70 }
  0xe5   :  { %v98_v26 = vrot.slane %v97_v22, 2  ;;  %v72_v27 = vrot.slane %v71_v24, 4 }
  0xe7   :  { %v73_v31 = vadd.f32 %v72_v27, %v71_v24  ;;  %v99_v34 = vadd.f32 %v98_v26, %v97_v22 }
  0xe8   :  { %v237_v33 = vpop.xlane.xlu0 %236 }
  0xe9   :  { %v74_v35 = vrot.slane %v73_v31, 2  ;;  %v238_v36 = vrot.slane %v237_v33, 4  ;;  %v100_v43 = vrot.slane %v99_v34, 1 }
  0xeb   :  { %v239_v40 = vadd.f32 %v238_v36, %v237_v33  ;;  %v75_v41 = vadd.f32 %v74_v35, %v73_v31  ;;  %v101_v53 = vadd.f32 %v100_v43, %v99_v34 }
  0xed   :  { %v240_v45 = vrot.slane %v239_v40, 2  ;;  %v76_v46 = vrot.slane %v75_v41, 1 }
  0xef   :  { %v241_v50 = vadd.f32 %v240_v45, %v239_v40  ;;  %v77_v51 = vadd.f32 %v76_v46, %v75_v41 }
  0xf1   :  { %328 = vpush %v77_v51  ;;  %v242_v56 = vrot.slane %v241_v50, 1 }
  0xf2   :  { %330 = vpush %v101_v53 }
  0xf3   :  { %332 = vpush %v125_v55  ;;  %v243_v60 = vadd.f32 %v242_v56, %v241_v50 }
  0xf4   :  { %334 = vpush %v150_v57 }
  0xf5   :  { %336 = vpush %v174_v59 }
  0xf6   :  { %338 = vpush %v219_v61 }
  0xf7   :  { %340 = vpush %v243_v60 }
  0xf8   :  { %342 = vpush %v266_v62 }
 0x122   :  { %s520_s1 = spop %328 }
 0x123   :  { %s331_s4 = spop %330  ;;  %v79_v16 = vstv %s520_s1 }
 0x124   :  { %s522_s5 = spop %332  ;;  %v103_v10 = vstv %s331_s4 }
 0x125   :  { %s524_s6 = spop %334  ;;  %v127_v11 = vstv %s522_s5 }
 0x126   :  { %s337_s7 = spop %336  ;;  %v177_v15 = vadd.f32 %v127_v11, %v103_v10  ;;  %v152_v25 = vstv %s524_s6 }
 0x127   :  { %v176_v63 = vstv %s337_s7  ;;  %s339_s8 = spop %338  ;;  %v181_v43 = vsub.f32 %v127_v11, %v152_v25 }
 0x128   :  { %v325_v1 = vadd.f32 -1.0, %v176_v63  ;;  %s341_s9 = spop %340  ;;  %v180_v4 = vsub.f32 512.0, %v176_v63  ;;  %v178_v18 = vsub.f32 %v177_v15, %v79_v16  ;;  %v221_v20 = vstv %s339_s8 }
 0x129   :  { %v245_v2 = vstv %s341_s9  ;;  %s343_s10 = spop %342  ;;  %v283_v26 = vmax.f32 %v176_v63, 1.0 }
 0x12a   :  { %v183_v3 = vmax.f32 %v325_v1, 0.0  ;;  %v269_v5 = vmax.f32 %v245_v2, 1.0  ;;  %v268_v6 = vstv %s343_s10  ;;  %v326_v9 = vadd.f32 -1.0, %v180_v4 }
 0x12b   :  { %v272_v8 = vmax.f32 %v268_v6, 1.0  ;;  %v179_v27 = vsub.f32 %v178_v18, %v152_v25  ;;  %v286_v29 = vmax.f32 %v180_v4, 1.0 }
 0x12c   :  { %v184_v7 = vadd.f32 1.0, %v183_v3  ;;  %v186_v13 = vmax.f32 %v326_v9, 0.0 }
 0x12e   :  { %353 = vrcp.f32 %v184_v7  ;;  %v187_v12 = vadd.f32 1.0, %v186_v13 }
 0x12f   :  { %355 = vrcp.f32 %v269_v5 }
 0x130   :  { %357 = vrcp.f32 %v272_v8 }
 0x131   :  { %359 = vrcp.f32 %v283_v26 }
 0x138   :  { %v354_v14 = vpop.eup %353 }
 0x139   :  { %v356_v17 = vpop.eup %355  ;;  %v189_v19 = vmul.f32 %v354_v14, %v187_v12 }
 0x13a   :  { %v358_v21 = vpop.eup %357  ;;  %v271_v22 = vmul.f32 %v356_v17, %v221_v20 }
 0x13b   :  { %v190_v23 = vmul.f32 %v189_v19, %v79_v16  ;;  %v274_v24 = vmul.f32 %v358_v21, %v221_v20  ;;  %v360_v37 = vpop.eup %359 }
 0x13c   :  { %v277_v34 = vmul.f32 2.0, %v271_v22  ;;  %v294_v36 = vsel %vm293_vm6, %v271_v22, 0.0  ;;  %v285_v44 = vmul.f32 %v360_v37, %v152_v25 }
 0x13d   :  { %v275_v28 = vadd.f32 %v274_v24, %v271_v22  ;;  %v191_v30 = vadd.f32 %v190_v23, %v179_v27  ;;  %v297_v45 = vsel %vm296_vm7, %v274_v24, 0.0 }
 0x13e   :  { %v278_v38 = vmul.f32 %v277_v34, %v274_v24  ;;  %v303_v50 = vsel %vm302_vm9, %v285_v44, 0.0 }
 0x13f   :  { %vm276_vm4 = vcmp.gt.f32.partialorder %v275_v28, 0.0  ;;  %v192_v33 = vmul.f32 0.001953125, %v191_v30 }
 0x140   :  { %v279_v31 = vsel %vm276_vm4, %v275_v28, 1.0 }
 0x141   :  { %361 = vrcp.f32 %v279_v31  ;;  %v292_v35 = vsel %vm291_vm5, %v192_v33, 0.0 }
 0x142   :  { %363 = vrcp.f32 %v286_v29  ;;  %v295_v39 = vadd.f32 %v294_v36, %v292_v35 }
 0x144   :  { %v298_v0 = vadd.f32 %v297_v45, %v295_v39 }
 0x14b   :  { %v362_v40 = vpop.eup %361 }
 0x14c   :  { %v364_v41 = vpop.eup %363  ;;  %v281_v42 = vmul.f32 %v362_v40, %v278_v38 }
 0x14d   :  { %v288_v47 = vmul.f32 %v364_v41, %v181_v43 }
 0x14e   :  { %v282_v46 = vsel %vm276_vm4, %v281_v42, 0.0 }
 0x14f   :  { %v300_v48 = vsel %vm299_vm8, %v282_v46, 0.0  ;;  %v306_v52 = vsel %vm305_vm10, %v288_v47, 0.0 }
 0x150   :  { %v301_v49 = vadd.f32 %v300_v48, %v298_v0 }
 0x152   :  { %v304_v51 = vadd.f32 %v303_v50, %v301_v49 }
 0x154   :  { %v307_v53 = vadd.f32 %v306_v52, %v304_v51 }
 0x156   :  { %308 = vst [vmem:[#allocation7] sm:$0x1] %v307_v53 }
 0x157   :  { %420 = shalt.err (!%p417_p6)
}
 0x158   :  { %s421_s17 = scalar_lea.hbm %s546_s2, 16 }
 0x159   :  { %p422_p7 = scmp.ne.s32.totalorder %s546_s2, %s421_s17  ;;  %p425_p8 = scmp.lt.u32.totalorder %s421_s17, %s546_s2 }
 0x15b   :  { %p427_p9 = pnand %p425_p8, %p422_p7 }
 0x15d   :  { %430 = shalt.err (!%p427_p9)
}
 0x15e   :  { %318 = dma.vmem_to_hbm [thread:$0]  %s316_s12, 16, %s546_s2, [#allocation4]  }
 0x15f   :  { %435 = dma.done.wait [#allocation4], 16  }
 0x160   :  { %436 = vsyncadd [#allocation4], 4294967280 }
 0x161   :  { %322 = vsyncpa [#allocation3], 1 }
 0x162   :  { %323 = vsyncpa [#allocation6], 1 }
 0x163   :  { %324 = vsyncpa [#allocation4], 1 }

</bundles_post_ra>
